<compile_context>
chip_gen: v6e
topology: v6e:2x2x1
jax: 0.10.0
libtpu: 0.0.40
codegen_flags: <defaults>
</compile_context>

<pallas_src>
import math
from functools import partial

import jax
import jax.numpy as jnp
from jax.experimental import pallas as pl
from jax.experimental.pallas import tpu as pltpu


def _eca_scale_kernel(x_ref, c_ref, s_ref):
    """Per-block channel-attention scale from the ORIGINAL (un-permuted) layout.

    x_ref : (TB, S*V)  lane-dense flat tile of x (flat index p = s*V + v)
    c_ref : (S*V, V)   combined avg-pool + Conv1d matrix, VMEM-resident
    s_ref : (TB, V)    sigmoid attention scale per (row, view)
    """
    # y[b, u] = sum_{s,v} x[b, s, v] * W[u, v] / S   ==   x_flat @ C
    # (MXU matmul is tiny and fully hidden under the input DMA stream.)
    y = jnp.dot(x_ref[...], c_ref[...], preferred_element_type=jnp.float32)
    # Note: in a partial final block the padding rows produce garbage here, but
    # their stores are dropped by Pallas, so this is harmless.
    s_ref[...] = jax.nn.sigmoid(y).astype(s_ref.dtype)


def _build_conv_band_matrix(weight, num_views):
    """1D conv kernel (k,) (in=out=1 channel, pad=k//2, no bias) -> (V, V) matrix
    W so that conv1d(p) == W @ p (cross-correlation, matching torch.nn.Conv1d)."""
    k = weight.shape[0]
    pad = k // 2
    row = jnp.arange(num_views)[:, None]      # output position u
    col = jnp.arange(num_views)[None, :]      # input position v
    idx = col - row + pad                     # tap index j = v - u + pad
    valid = (idx >= 0) & (idx < k)
    idx_c = jnp.clip(idx, 0, k - 1)
    return jnp.where(valid, weight[idx_c], 0.0).astype(jnp.float32)


def _round_up(a, m):
    return ((a + m - 1) // m) * m


@partial(jax.jit, static_argnames=("block_b",))
def efficient_channel_attention(x, conv_weight, *, block_b=1024):
    """x: (N, T, F, XY, V) float32.  Returns (N, T, V, F, XY), matching the
    PyTorch forward (views permuted to the channel axis, not permuted back)."""
    N, T, Fdim, XY, V = x.shape
    B = N * T
    S = Fdim * XY
    SV = S * V                                 # lane dim of the kernel input;
                                               # a multiple of 128 is ideal.

    # Fold AdaptiveAvgPool2d(1) and Conv1d into one (S*V, V) matrix:
    #   C[s*V + v, u] = W[u, v] / S
    W = _build_conv_band_matrix(conv_weight, V)            # (V, V)
    C = jnp.tile(W.T / S, (S, 1))                          # (S*V, V)
    # NOTE: C is lane-padded 8->128 in VMEM; for very large S it should be
    # split over a K grid axis, but at typical shapes it is ~0.5 MiB.

    # Free reshape: original layout, no data movement.
    x_flat = x.reshape(B, SV)

    # --- tile size: VMEM-budget derived, multiple of 8, >=4 grid steps -------
    vmem_budget = 12 * 1024 * 1024             # double-buffered input blocks
    tb_budget = max(8, ((vmem_budget // (2 * SV * 4)) // 8) * 8)
    if B <= 8:
        tb = B                                 # single block; dim == array dim
    else:
        tb = min(block_b, tb_budget, max(8, _round_up(pl.cdiv(B, 4), 8)))
        tb = max(8, (tb // 8) * 8)
    grid = (pl.cdiv(B, tb),)

    scale = pl.pallas_call(
        _eca_scale_kernel,
        out_shape=jax.ShapeDtypeStruct((B, V), jnp.float32),
        grid=grid,
        in_specs=[
            pl.BlockSpec((tb, SV), lambda i: (i, 0)),      # streamed input
            pl.BlockSpec((SV, V), lambda i: (0, 0)),       # resident weights
        ],
        out_specs=pl.BlockSpec((tb, V), lambda i: (i, 0)),
        compiler_params=pltpu.CompilerParams(
            dimension_semantics=("parallel",)),
        cost_estimate=pl.CostEstimate(
            flops=2 * B * SV * V,
            transcendentals=B * V,
            bytes_accessed=B * SV * 4 + B * V * 4 + SV * V * 4),
    )(x_flat, C)

    scale = scale.reshape(N, T, V)

    # Fused scale-and-permute: XLA fuses the broadcast-multiply into the
    # (0, 1, 4, 2, 3) transpose copy -> one read + one write of x-sized data.
    out = jnp.transpose(x, (0, 1, 4, 2, 3)) * scale[..., None, None]
    return out.astype(x.dtype)


def eca_reference(x, conv_weight):
    """Pure-JAX reference of the PyTorch forward, for correctness checking."""
    xp = jnp.transpose(x, (0, 1, 4, 2, 3))                  # (N, T, V, F, XY)
    pooled = jnp.mean(xp, axis=(-2, -1))                    # (N, T, V)
    k = conv_weight.shape[0]
    pad = k // 2
    V = pooled.shape[-1]
    pp = jnp.pad(pooled, ((0, 0), (0, 0), (pad, pad)))
    y = sum(conv_weight[j] * pp[..., j:j + V] for j in range(k))
    scale = jax.nn.sigmoid(y)                               # (N, T, V)
    return xp * scale[..., None, None]


if __name__ == "__main__":
    # Module hyper-params (defaults from __init__): gamma=2, b=1, num_views=8
    gamma, b_param, num_views = 2, 1, 8
    t = int(abs((math.log(num_views, 2) + b_param) / gamma))
    k = t if t % 2 else t + 1                               # -> k = 3

    key = jax.random.PRNGKey(0)
    kx, kw = jax.random.split(key)

    # Small shapes consistent with the forward: (N, T, F, XY, V); S*V = 1024.
    N, T, Fdim, XY, V = 2, 12, 8, 16, num_views             # B = 24
    x = jax.random.normal(kx, (N, T, Fdim, XY, V), dtype=jnp.float32)

    # Deterministic conv1d weight of shape (out=1, in=1, k) -> stored as (k,).
    bound = 1.0 / math.sqrt(k)
    conv_weight = jax.random.uniform(
        kw, (k,), minval=-bound, maxval=bound, dtype=jnp.float32)

    # tb auto-clamps to 8 here (B=24 -> 3 grid steps), exercising the pipeline.
    out = efficient_channel_attention(x, conv_weight)
    out = jax.block_until_ready(out)
    assert out.shape == (N, T, V, Fdim, XY), out.shape

    ref = eca_reference(x, conv_weight)
    max_err = float(jnp.max(jnp.abs(out - ref)))
    assert max_err < 1e-3, f"max abs error vs reference: {max_err}"

    print("KERNEL_OK")
</pallas_src>

<mosaic_0001>
module attributes {stable_mosaic.version = 11 : i64} {
  func.func @_eca_scale_kernel(%arg0: i32, %arg1: memref<8x1024xf32, #tpu.memory_space<vmem>>, %arg2: memref<1024x8xf32, #tpu.memory_space<vmem>>, %arg3: memref<8x8xf32, #tpu.memory_space<vmem>>) attributes {dimension_semantics = [#tpu.dimension_semantics<parallel>], iteration_bounds = array<i64: 3>, scalar_prefetch = 0 : i64, scratch_operands = 0 : i64, tpu.core_type = #tpu.core_type<tc>, window_params = [{transform_indices = @transform_0, window_bounds = array<i64: 8, 1024>}, {pipeline_mode = #tpu.pipeline_mode<synchronous>, transform_indices = @transform_1, window_bounds = array<i64: 1024, 8>}, {transform_indices = @transform_2, window_bounds = array<i64: 8, 8>}]} {
    %c0 = arith.constant 0 : index
    %c0_0 = arith.constant 0 : index
    %0 = vector.load %arg1[%c0, %c0_0] : memref<8x1024xf32, #tpu.memory_space<vmem>>, vector<8x1024xf32>
    %c0_1 = arith.constant 0 : index
    %c0_2 = arith.constant 0 : index
    %1 = vector.load %arg2[%c0_1, %c0_2] : memref<1024x8xf32, #tpu.memory_space<vmem>>, vector<1024x8xf32>
    %cst = arith.constant dense<0.000000e+00> : vector<8x8xf32>
    %2 = tpu.matmul %0, %1, %cst {dimension_numbers = #tpu.dot_dimension_numbers<[1], [0], [0], [1], [0, 0, 1, 1], [], []>} : vector<8x1024xf32>, vector<1024x8xf32>, vector<8x8xf32> -> vector<8x8xf32>
    %3 = arith.negf %2 : vector<8x8xf32>
    %4 = math.exp %3 : vector<8x8xf32>
    %cst_3 = arith.constant 1.000000e+00 : f32
    %5 = vector.broadcast %cst_3 : f32 to vector<8x8xf32>
    %6 = arith.addf %5, %4 : vector<8x8xf32>
    %7 = arith.divf %5, %6 : vector<8x8xf32>
    %c0_4 = arith.constant 0 : index
    %c0_5 = arith.constant 0 : index
    %8 = vector.load %arg3[%c0_4, %c0_5] : memref<8x8xf32, #tpu.memory_space<vmem>>, vector<8x8xf32>
    tpu.vector_store %arg3[%c0_4, %c0_5], %7 {strides = array<i32>} : memref<8x8xf32, #tpu.memory_space<vmem>>, vector<8x8xf32>,
    return
  }
  func.func @transform_0(%arg0: i32) -> (i32, i32) {
    %c0_i32 = arith.constant 0 : i32
    %c0_i32_0 = arith.constant 0 : i32
    return %arg0, %c0_i32 : i32, i32
  }
  func.func @transform_1(%arg0: i32) -> (i32, i32) {
    %c0_i32 = arith.constant 0 : i32
    %c0_i32_0 = arith.constant 0 : i32
    %c0_i32_1 = arith.constant 0 : i32
    return %c0_i32, %c0_i32_0 : i32, i32
  }
  func.func @transform_2(%arg0: i32) -> (i32, i32) {
    %c0_i32 = arith.constant 0 : i32
    %c0_i32_0 = arith.constant 0 : i32
    return %arg0, %c0_i32 : i32, i32
  }
}

</mosaic_0001>

<bundles_post_ra>
// kernel: efficient_channel_attention.1
= control target key start
LH: loop header
LB: loop body
LE: loop exit
PB: predicated region body
PF: predicated region fallthrough
CT: control target
= control target key end

     0   :  { %s806_s9 = smov 0   ;;  %s1231_s0 = inlined_call_operand.vmem [shape: f32[24,1024], index: 0, kind: input, shape index: {}]   ;;  %s1232_s1 = inlined_call_operand.vmem [shape: f32[1024,8], index: 1, kind: input, shape index: {}]   ;;  %s1233_s2 = inlined_call_operand.vmem [shape: f32[24,8], index: 2, kind: output, shape index: {}]  }
   0x1 LB: > { %s619_s10 = sadd.s32 4294967295, %s789_s9   ;;  %p623_p0 = scmp.ge.s32.totalorder %s789_s9, 1  ;;  %s789_s9 = sphi %s806_s9, %s12_s9  }
   0x2   : > { %p112_p1 = scmp.lt.s32.totalorder %s789_s9, 4 }
   0x4   : > { %p113_p2 = pnand %p623_p0, %p112_p1 }
   0x5   : > { %p924_p3 = scmp.lt.s32.totalorder (!%p113_p2), %s619_s10, 2 }
   0x6   : > { %116 = sbr.rel (%p113_p2) target bundleno = 314 (0x13a), region = 28 }
   0xb   : > { %v181_v0 = vld [vmem:[%s1232_s1 + $0xf8] sm:$0xff]  ;;  %v180_v4 = vld [vmem:[%s1232_s1 + $0xf0] sm:$0xff]  ;;  %v179_v8 = vld [vmem:[%s1232_s1 + $0xe8] sm:$0xff]  ;;  %s1236_s10 = smov (!%p924_p3, %s619_s10), 2  ;;  %vm564_vm0 = vcmask 64512  }
   0xc   : > { %v213_v1 = vld [vmem:[%s1232_s1 + $0x1f8] sm:$0xff]  ;;  %631 = vmatprep.subr.mxu0 %v181_v0  ;;  %v212_v5 = vld [vmem:[%s1232_s1 + $0x1f0] sm:$0xff]  ;;  %v211_v9 = vld [vmem:[%s1232_s1 + $0x1e8] sm:$0xff]  ;;  %s630_s12 = sshll.u32 %s1236_s10, 6 }
   0xd   : > { %v165_v2 = vld [vmem:[%s1232_s1 + $0x78] sm:$0xff]  ;;  %666 = vmatprep.subr.mxu1 %v213_v1  ;;  %v164_v6 = vld [vmem:[%s1232_s1 + $0x70] sm:$0xff]  ;;  %v163_v10 = vld [vmem:[%s1232_s1 + $0x68] sm:$0xff]  ;;  %s1004_s27 = scalar_lea.vmem %s1231_s0, %s630_s12 }
   0xe   : > { %v197_v3 = vld [vmem:[%s1232_s1 + $0x178] sm:$0xff]  ;;  %632 = vmatpush3.msra.mxu0 %v165_v2  ;;  %v196_v7 = vld [vmem:[%s1232_s1 + $0x170] sm:$0xff]  ;;  %v195_v11 = vld [vmem:[%s1232_s1 + $0x168] sm:$0xff] }
   0xf   : > { %667 = vmatpush3.msra.mxu1 %v197_v3  ;;  %633 = vmatprep.subr.mxu0 %v180_v4  ;;  %v178_v12 = vld [vmem:[%s1232_s1 + $0xe0] sm:$0xff]  ;;  %v177_v16 = vld [vmem:[%s1232_s1 + $0xd8] sm:$0xff]  ;;  %v176_v20 = vld [vmem:[%s1232_s1 + $0xd0] sm:$0xff] }
  0x10   : > { %668 = vmatprep.subr.mxu1 %v212_v5  ;;  %634 = vmatpush3.msra.mxu0 %v164_v6  ;;  %v210_v13 = vld [vmem:[%s1232_s1 + $0x1e0] sm:$0xff]  ;;  %v209_v17 = vld [vmem:[%s1232_s1 + $0x1d8] sm:$0xff]  ;;  %v208_v21 = vld [vmem:[%s1232_s1 + $0x1d0] sm:$0xff] }
  0x11   : > { %669 = vmatpush3.msra.mxu1 %v196_v7  ;;  %635 = vmatprep.subr.mxu0 %v179_v8  ;;  %v162_v14 = vld [vmem:[%s1232_s1 + $0x60] sm:$0xff]  ;;  %v161_v18 = vld [vmem:[%s1232_s1 + $0x58] sm:$0xff]  ;;  %v160_v22 = vld [vmem:[%s1232_s1 + $0x50] sm:$0xff] }
  0x12   : > { %670 = vmatprep.subr.mxu1 %v211_v9  ;;  %v194_v15 = vld [vmem:[%s1232_s1 + $0x160] sm:$0xff]  ;;  %636 = vmatpush3.msra.mxu0 %v163_v10  ;;  %v193_v19 = vld [vmem:[%s1232_s1 + $0x158] sm:$0xff]  ;;  %v192_v23 = vld [vmem:[%s1232_s1 + $0x150] sm:$0xff] }
  0x13   : > { %671 = vmatpush3.msra.mxu1 %v195_v11  ;;  %637 = vmatprep.subr.mxu0 %v178_v12  ;;  %v175_v24 = vld [vmem:[%s1232_s1 + $0xc8] sm:$0xff]  ;;  %v174_v28 = vld [vmem:[%s1232_s1 + $0xc0] sm:$0xff]  ;;  %v173_v32 = vld [vmem:[%s1232_s1 + $0xb8] sm:$0xff] }
  0x14   : > { %672 = vmatprep.subr.mxu1 %v210_v13  ;;  %638 = vmatpush3.msra.mxu0 %v162_v14  ;;  %v207_v25 = vld [vmem:[%s1232_s1 + $0x1c8] sm:$0xff]  ;;  %v206_v29 = vld [vmem:[%s1232_s1 + $0x1c0] sm:$0xff]  ;;  %v205_v33 = vld [vmem:[%s1232_s1 + $0x1b8] sm:$0xff] }
  0x15   : > { %673 = vmatpush3.msra.mxu1 %v194_v15  ;;  %639 = vmatprep.subr.mxu0 %v177_v16  ;;  %v159_v26 = vld [vmem:[%s1232_s1 + $0x48] sm:$0xff]  ;;  %v158_v30 = vld [vmem:[%s1232_s1 + $0x40] sm:$0xff]  ;;  %v157_v34 = vld [vmem:[%s1232_s1 + $0x38] sm:$0xff] }
  0x16   : > { %674 = vmatprep.subr.mxu1 %v209_v17  ;;  %640 = vmatpush3.msra.mxu0 %v161_v18  ;;  %v191_v27 = vld [vmem:[%s1232_s1 + $0x148] sm:$0xff]  ;;  %v190_v31 = vld [vmem:[%s1232_s1 + $0x140] sm:$0xff]  ;;  %v189_v35 = vld [vmem:[%s1232_s1 + $0x138] sm:$0xff] }
  0x17   : > { %675 = vmatpush3.msra.mxu1 %v193_v19  ;;  %641 = vmatprep.subr.mxu0 %v176_v20  ;;  %v172_v36 = vld [vmem:[%s1232_s1 + $0xb0] sm:$0xff]  ;;  %v171_v40 = vld [vmem:[%s1232_s1 + $0xa8] sm:$0xff]  ;;  %v170_v44 = vld [vmem:[%s1232_s1 + $0xa0] sm:$0xff] }
  0x18   : > { %676 = vmatprep.subr.mxu1 %v208_v21  ;;  %642 = vmatpush3.msra.mxu0 %v160_v22  ;;  %v204_v37 = vld [vmem:[%s1232_s1 + $0x1b0] sm:$0xff]  ;;  %v203_v41 = vld [vmem:[%s1232_s1 + $0x1a8] sm:$0xff]  ;;  %v202_v45 = vld [vmem:[%s1232_s1 + $0x1a0] sm:$0xff] }
  0x19   : > { %677 = vmatpush3.msra.mxu1 %v192_v23  ;;  %643 = vmatprep.subr.mxu0 %v175_v24  ;;  %v156_v38 = vld [vmem:[%s1232_s1 + $0x30] sm:$0xff]  ;;  %v155_v42 = vld [vmem:[%s1232_s1 + $0x28] sm:$0xff]  ;;  %v154_v46 = vld [vmem:[%s1232_s1 + $0x20] sm:$0xff] }
  0x1a   : > { %678 = vmatprep.subr.mxu1 %v207_v25  ;;  %644 = vmatpush3.msra.mxu0 %v159_v26  ;;  %v188_v39 = vld [vmem:[%s1232_s1 + $0x130] sm:$0xff]  ;;  %v187_v43 = vld [vmem:[%s1232_s1 + $0x128] sm:$0xff]  ;;  %v186_v47 = vld [vmem:[%s1232_s1 + $0x120] sm:$0xff] }
  0x1b   : > { %679 = vmatpush3.msra.mxu1 %v191_v27  ;;  %645 = vmatprep.subr.mxu0 %v174_v28  ;;  %v169_v48 = vld [vmem:[%s1232_s1 + $0x98] sm:$0xff]  ;;  %v168_v52 = vld [vmem:[%s1232_s1 + $0x90] sm:$0xff]  ;;  %v167_v56 = vld [vmem:[%s1232_s1 + $0x88] sm:$0xff] }
  0x1c   : > { %680 = vmatprep.subr.mxu1 %v206_v29  ;;  %646 = vmatpush3.msra.mxu0 %v158_v30  ;;  %v201_v49 = vld [vmem:[%s1232_s1 + $0x198] sm:$0xff]  ;;  %v200_v53 = vld [vmem:[%s1232_s1 + $0x190] sm:$0xff]  ;;  %v199_v57 = vld [vmem:[%s1232_s1 + $0x188] sm:$0xff] }
  0x1d   : > { %681 = vmatpush3.msra.mxu1 %v190_v31  ;;  %647 = vmatprep.subr.mxu0 %v173_v32  ;;  %v153_v50 = vld [vmem:[%s1232_s1 + $0x18] sm:$0xff]  ;;  %v152_v54 = vld [vmem:[%s1232_s1 + $0x10] sm:$0xff]  ;;  %v151_v58 = vld [vmem:[%s1232_s1 + $0x8] sm:$0xff] }
  0x1e   : > { %682 = vmatprep.subr.mxu1 %v205_v33  ;;  %648 = vmatpush3.msra.mxu0 %v157_v34  ;;  %v185_v51 = vld [vmem:[%s1232_s1 + $0x118] sm:$0xff]  ;;  %v184_v55 = vld [vmem:[%s1232_s1 + $0x110] sm:$0xff]  ;;  %v183_v59 = vld [vmem:[%s1232_s1 + $0x108] sm:$0xff] }
  0x1f   : > { %683 = vmatpush3.msra.mxu1 %v189_v35  ;;  %649 = vmatprep.subr.mxu0 %v172_v36  ;;  %v166_v60 = vld [vmem:[%s1232_s1 + $0x80] sm:$0xff]  ;;  %v143_v63 = vld [vmem:[%s1004_s27 + $0x8] sm:$0xff]  ;;  %v145_v1 = vld [vmem:[%s1004_s27 + $0x18] sm:$0xff] }
  0x20   : > { %684 = vmatprep.subr.mxu1 %v204_v37  ;;  %650 = vmatpush3.msra.mxu0 %v156_v38  ;;  %v198_v61 = vld [vmem:[%s1232_s1 + $0x180] sm:$0xff]  ;;  %v144_v3 = vld [vmem:[%s1004_s27 + $0x10] sm:$0xff]  ;;  %v245_v4 = vld [vmem:[%s1232_s1 + $0x2f8] sm:$0xff] }
  0x21   : > { %685 = vmatpush3.msra.mxu1 %v188_v39  ;;  %651 = vmatprep.subr.mxu0 %v171_v40  ;;  %v150_v62 = vld [vmem:[%s1232_s1] sm:$0xff]  ;;  %v277_v5 = vld [vmem:[%s1232_s1 + $0x3f8] sm:$0xff]  ;;  %v244_v8 = vld [vmem:[%s1232_s1 + $0x2f0] sm:$0xff] }
  0x22   : > { %686 = vmatprep.subr.mxu1 %v203_v41  ;;  %652 = vmatpush3.msra.mxu0 %v155_v42  ;;  %v182_v0 = vld [vmem:[%s1232_s1 + $0x100] sm:$0xff]  ;;  %v229_v6 = vld [vmem:[%s1232_s1 + $0x278] sm:$0xff]  ;;  %v276_v9 = vld [vmem:[%s1232_s1 + $0x3f0] sm:$0xff] }
  0x23   : > { %687 = vmatpush3.msra.mxu1 %v187_v43  ;;  %653 = vmatprep.subr.mxu0 %v170_v44  ;;  %v142_v2 = vld [vmem:[%s1004_s27] sm:$0xff]  ;;  %v261_v7 = vld [vmem:[%s1232_s1 + $0x378] sm:$0xff]  ;;  %v228_v10 = vld [vmem:[%s1232_s1 + $0x270] sm:$0xff] }
  0x24   : > { %688 = vmatprep.subr.mxu1 %v202_v45  ;;  %654 = vmatpush3.msra.mxu0 %v154_v46  ;;  %v260_v11 = vld [vmem:[%s1232_s1 + $0x370] sm:$0xff]  ;;  %v243_v12 = vld [vmem:[%s1232_s1 + $0x2e8] sm:$0xff]  ;;  %v242_v16 = vld [vmem:[%s1232_s1 + $0x2e0] sm:$0xff] }
  0x25   : > { %689 = vmatpush3.msra.mxu1 %v186_v47  ;;  %655 = vmatprep.subr.mxu0 %v169_v48  ;;  %v275_v13 = vld [vmem:[%s1232_s1 + $0x3e8] sm:$0xff]  ;;  %v274_v17 = vld [vmem:[%s1232_s1 + $0x3e0] sm:$0xff]  ;;  %v241_v20 = vld [vmem:[%s1232_s1 + $0x2d8] sm:$0xff] }
  0x26   : > { %690 = vmatprep.subr.mxu1 %v201_v49  ;;  %656 = vmatpush3.msra.mxu0 %v153_v50  ;;  %v227_v14 = vld [vmem:[%s1232_s1 + $0x268] sm:$0xff]  ;;  %v226_v18 = vld [vmem:[%s1232_s1 + $0x260] sm:$0xff]  ;;  %v273_v21 = vld [vmem:[%s1232_s1 + $0x3d8] sm:$0xff] }
  0x27   : > { %691 = vmatpush3.msra.mxu1 %v185_v51  ;;  %657 = vmatprep.subr.mxu0 %v168_v52  ;;  %v259_v15 = vld [vmem:[%s1232_s1 + $0x368] sm:$0xff]  ;;  %v258_v19 = vld [vmem:[%s1232_s1 + $0x360] sm:$0xff]  ;;  %v225_v22 = vld [vmem:[%s1232_s1 + $0x258] sm:$0xff] }
  0x28   : > { %692 = vmatprep.subr.mxu1 %v200_v53  ;;  %658 = vmatpush3.msra.mxu0 %v152_v54  ;;  %v257_v23 = vld [vmem:[%s1232_s1 + $0x358] sm:$0xff]  ;;  %v240_v24 = vld [vmem:[%s1232_s1 + $0x2d0] sm:$0xff]  ;;  %v239_v28 = vld [vmem:[%s1232_s1 + $0x2c8] sm:$0xff] }
  0x29   : > { %693 = vmatpush3.msra.mxu1 %v184_v55  ;;  %659 = vmatprep.subr.mxu0 %v167_v56  ;;  %v272_v25 = vld [vmem:[%s1232_s1 + $0x3d0] sm:$0xff]  ;;  %v271_v29 = vld [vmem:[%s1232_s1 + $0x3c8] sm:$0xff]  ;;  %v238_v32 = vld [vmem:[%s1232_s1 + $0x2c0] sm:$0xff] }
  0x2a   : > { %694 = vmatprep.subr.mxu1 %v199_v57  ;;  %660 = vmatpush3.msra.mxu0 %v151_v58  ;;  %v224_v26 = vld [vmem:[%s1232_s1 + $0x250] sm:$0xff]  ;;  %v223_v30 = vld [vmem:[%s1232_s1 + $0x248] sm:$0xff]  ;;  %v270_v33 = vld [vmem:[%s1232_s1 + $0x3c0] sm:$0xff] }
  0x2b   : > { %695 = vmatpush3.msra.mxu1 %v183_v59  ;;  %661 = vmatprep.subr.mxu0 %v166_v60  ;;  %v256_v27 = vld [vmem:[%s1232_s1 + $0x350] sm:$0xff]  ;;  %v255_v31 = vld [vmem:[%s1232_s1 + $0x348] sm:$0xff]  ;;  %v222_v34 = vld [vmem:[%s1232_s1 + $0x240] sm:$0xff] }
  0x2c   : > { %696 = vmatprep.subr.mxu1 %v198_v61  ;;  %662 = vmatpush3.msra.mxu0 %v150_v62  ;;  %v254_v35 = vld [vmem:[%s1232_s1 + $0x340] sm:$0xff]  ;;  %v237_v36 = vld [vmem:[%s1232_s1 + $0x2b8] sm:$0xff]  ;;  %v236_v40 = vld [vmem:[%s1232_s1 + $0x2b0] sm:$0xff] }
  0x2d   : > { %342 = vmatprep.mubr.f32.mxu0 %v143_v63  ;;  %697 = vmatpush3.msra.mxu1 %v182_v0  ;;  %v269_v37 = vld [vmem:[%s1232_s1 + $0x3b8] sm:$0xff]  ;;  %v268_v41 = vld [vmem:[%s1232_s1 + $0x3b0] sm:$0xff]  ;;  %v235_v44 = vld [vmem:[%s1232_s1 + $0x2a8] sm:$0xff] }
  0x2e   : > { %412 = vmatprep.mubr.f32.mxu1 %v145_v1  ;;  %343 = vmatmul.mubr.f32.vlgmr.msra.gmra.mxu0 %v142_v2  ;;  %v221_v38 = vld [vmem:[%s1232_s1 + $0x238] sm:$0xff]  ;;  %v220_v42 = vld [vmem:[%s1232_s1 + $0x230] sm:$0xff]  ;;  %v267_v45 = vld [vmem:[%s1232_s1 + $0x3a8] sm:$0xff] }
  0x2f   : > { %413 = vmatmul.mubr.f32.vlgmr.msra.gmra.mxu1 %v144_v3  ;;  %701 = vmatprep.subr.mxu0 %v245_v4  ;;  %v253_v39 = vld [vmem:[%s1232_s1 + $0x338] sm:$0xff]  ;;  %v252_v43 = vld [vmem:[%s1232_s1 + $0x330] sm:$0xff]  ;;  %v219_v46 = vld [vmem:[%s1232_s1 + $0x228] sm:$0xff] }
  0x30   : > { %736 = vmatprep.subr.mxu1 %v277_v5  ;;  %702 = vmatpush3.msra.mxu0 %v229_v6  ;;  %v251_v47 = vld [vmem:[%s1232_s1 + $0x328] sm:$0xff]  ;;  %v234_v48 = vld [vmem:[%s1232_s1 + $0x2a0] sm:$0xff]  ;;  %v233_v52 = vld [vmem:[%s1232_s1 + $0x298] sm:$0xff] }
  0x31   : > { %737 = vmatpush3.msra.mxu1 %v261_v7  ;;  %703 = vmatprep.subr.mxu0 %v244_v8  ;;  %v266_v49 = vld [vmem:[%s1232_s1 + $0x3a0] sm:$0xff]  ;;  %v265_v53 = vld [vmem:[%s1232_s1 + $0x398] sm:$0xff]  ;;  %v232_v56 = vld [vmem:[%s1232_s1 + $0x290] sm:$0xff] }
  0x32   : > { %738 = vmatprep.subr.mxu1 %v276_v9  ;;  %704 = vmatpush3.msra.mxu0 %v228_v10  ;;  %v218_v50 = vld [vmem:[%s1232_s1 + $0x220] sm:$0xff]  ;;  %v217_v54 = vld [vmem:[%s1232_s1 + $0x218] sm:$0xff]  ;;  %v264_v57 = vld [vmem:[%s1232_s1 + $0x390] sm:$0xff] }
  0x33   : > { %739 = vmatpush3.msra.mxu1 %v260_v11  ;;  %705 = vmatprep.subr.mxu0 %v243_v12  ;;  %v250_v51 = vld [vmem:[%s1232_s1 + $0x320] sm:$0xff]  ;;  %v249_v55 = vld [vmem:[%s1232_s1 + $0x318] sm:$0xff]  ;;  %v216_v58 = vld [vmem:[%s1232_s1 + $0x210] sm:$0xff] }
  0x34   : > { %740 = vmatprep.subr.mxu1 %v275_v13  ;;  %706 = vmatpush3.msra.mxu0 %v227_v14  ;;  %v248_v59 = vld [vmem:[%s1232_s1 + $0x310] sm:$0xff]  ;;  %v231_v60 = vld [vmem:[%s1232_s1 + $0x288] sm:$0xff]  ;;  %v230_v0 = vld [vmem:[%s1232_s1 + $0x280] sm:$0xff] }
  0x35   : > { %741 = vmatpush3.msra.mxu1 %v259_v15  ;;  %707 = vmatprep.subr.mxu0 %v242_v16  ;;  %v263_v61 = vld [vmem:[%s1232_s1 + $0x388] sm:$0xff]  ;;  %v262_v1 = vld [vmem:[%s1232_s1 + $0x380] sm:$0xff]  ;;  %v149_v5 = vld [vmem:[%s1004_s27 + $0x38] sm:$0xff] }
  0x36   : > { %742 = vmatprep.subr.mxu1 %v274_v17  ;;  %708 = vmatpush3.msra.mxu0 %v226_v18  ;;  %v215_v62 = vld [vmem:[%s1232_s1 + $0x208] sm:$0xff]  ;;  %v214_v2 = vld [vmem:[%s1232_s1 + $0x200] sm:$0xff]  ;;  %v148_v7 = vld [vmem:[%s1004_s27 + $0x30] sm:$0xff] }
  0x37   : > { %743 = vmatpush3.msra.mxu1 %v258_v19  ;;  %709 = vmatprep.subr.mxu0 %v241_v20  ;;  %v247_v63 = vld [vmem:[%s1232_s1 + $0x308] sm:$0xff]  ;;  %v246_v4 = vld [vmem:[%s1232_s1 + $0x300] sm:$0xff] }
  0x38   : > { %744 = vmatprep.subr.mxu1 %v273_v21  ;;  %710 = vmatpush3.msra.mxu0 %v225_v22  ;;  %v147_v3 = vld [vmem:[%s1004_s27 + $0x28] sm:$0xff]  ;;  %v146_v6 = vld [vmem:[%s1004_s27 + $0x20] sm:$0xff]  ;;  %s626_s27 = sshll.u32 %s1236_s10, 3 }
  0x39   : > { %745 = vmatpush3.msra.mxu1 %v257_v23  ;;  %711 = vmatprep.subr.mxu0 %v240_v24  ;;  %s141_s19 = scalar_lea.vmem %s1233_s2, %s626_s27 }
  0x3a   : > { %746 = vmatprep.subr.mxu1 %v272_v25  ;;  %712 = vmatpush3.msra.mxu0 %v224_v26 }
  0x3b   : > { %747 = vmatpush3.msra.mxu1 %v256_v27  ;;  %713 = vmatprep.subr.mxu0 %v239_v28 }
  0x3c   : > { %748 = vmatprep.subr.mxu1 %v271_v29  ;;  %714 = vmatpush3.msra.mxu0 %v223_v30 }
  0x3d   : > { %749 = vmatpush3.msra.mxu1 %v255_v31  ;;  %715 = vmatprep.subr.mxu0 %v238_v32 }
  0x3e   : > { %750 = vmatprep.subr.mxu1 %v270_v33  ;;  %716 = vmatpush3.msra.mxu0 %v222_v34 }
  0x3f   : > { %751 = vmatpush3.msra.mxu1 %v254_v35  ;;  %717 = vmatprep.subr.mxu0 %v237_v36 }
  0x40   : > { %752 = vmatprep.subr.mxu1 %v269_v37  ;;  %718 = vmatpush3.msra.mxu0 %v221_v38 }
  0x41   : > { %753 = vmatpush3.msra.mxu1 %v253_v39  ;;  %719 = vmatprep.subr.mxu0 %v236_v40 }
  0x42   : > { %754 = vmatprep.subr.mxu1 %v268_v41  ;;  %720 = vmatpush3.msra.mxu0 %v220_v42 }
  0x43   : > { %755 = vmatpush3.msra.mxu1 %v252_v43  ;;  %721 = vmatprep.subr.mxu0 %v235_v44 }
  0x44   : > { %756 = vmatprep.subr.mxu1 %v267_v45  ;;  %722 = vmatpush3.msra.mxu0 %v219_v46 }
  0x45   : > { %757 = vmatpush3.msra.mxu1 %v251_v47  ;;  %723 = vmatprep.subr.mxu0 %v234_v48 }
  0x46   : > { %758 = vmatprep.subr.mxu1 %v266_v49  ;;  %724 = vmatpush3.msra.mxu0 %v218_v50 }
  0x47   : > { %759 = vmatpush3.msra.mxu1 %v250_v51  ;;  %725 = vmatprep.subr.mxu0 %v233_v52 }
  0x48   : > { %760 = vmatprep.subr.mxu1 %v265_v53  ;;  %726 = vmatpush3.msra.mxu0 %v217_v54 }
  0x49   : > { %761 = vmatpush3.msra.mxu1 %v249_v55  ;;  %727 = vmatprep.subr.mxu0 %v232_v56 }
  0x4a   : > { %762 = vmatprep.subr.mxu1 %v264_v57  ;;  %728 = vmatpush3.msra.mxu0 %v216_v58 }
  0x4b   : > { %763 = vmatpush3.msra.mxu1 %v248_v59  ;;  %729 = vmatprep.subr.mxu0 %v231_v60 }
  0x4c   : > { %764 = vmatprep.subr.mxu1 %v263_v61  ;;  %730 = vmatpush3.msra.mxu0 %v215_v62 }
  0x4d   : > { %765 = vmatpush3.msra.mxu1 %v247_v63  ;;  %731 = vmatprep.subr.mxu0 %v230_v0 }
  0x4e   : > { %766 = vmatprep.subr.mxu1 %v262_v1  ;;  %732 = vmatpush3.msra.mxu0 %v214_v2 }
  0x4f   : > { %482 = vmatprep.mubr.f32.mxu0 %v147_v3  ;;  %767 = vmatpush3.msra.mxu1 %v246_v4 }
  0x50   : > { %552 = vmatprep.mubr.f32.mxu1 %v149_v5  ;;  %483 = vmatmul.mubr.f32.vlgmr.msra.gmra.mxu0 %v146_v6 }
  0x51   : > { %553 = vmatmul.mubr.f32.vlgmr.msra.gmra.mxu1 %v148_v7 }
  0xee   : > { %v663_v8 = vpop.f32.mrf.mxu0 }
  0xef   : > { %v698_v9 = vpop.f32.mrf.mxu1 }
  0xf0   : > { %v664_v10 = vpop.f32.mrf.mxu0 }
  0xf1   : > { %v699_v11 = vpop.f32.mrf.mxu1  ;;  %v665_v12 = vadd.f32 %v664_v10, %v663_v8 }
  0xf2   : > { %v700_v13 = vadd.f32 %v699_v11, %v698_v9 }
  0xf4   : > { %v415_v18 = vadd.f32 %v700_v13, %v665_v12 }
 0x110   : > { %v733_v14 = vpop.f32.mrf.mxu0 }
 0x111   : > { %v768_v15 = vpop.f32.mrf.mxu1 }
 0x112   : > { %v734_v16 = vpop.f32.mrf.mxu0 }
 0x113   : > { %v769_v17 = vpop.f32.mrf.mxu1  ;;  %v735_v19 = vadd.f32 %v734_v16, %v733_v14 }
 0x114   : > { %v770_v21 = vadd.f32 %v769_v17, %v768_v15 }
 0x115   : > { %v485_v20 = vadd.f32 %v735_v19, %v415_v18 }
 0x117   : > { %v555_v22 = vadd.f32 %v770_v21, %v485_v20 }
 0x119   : > { %v627_v23 = vmul.f32 -1.442695, %v555_v22 }
 0x11b   : > { %779 = vpow2.f32 %v627_v23 }
 0x128   : > { %v780_v24 = vpop.eup %779 }
 0x129   : > { %v561_v25 = vadd.f32 1.0, %v780_v24 }
 0x12b   : > { %781 = vrcp.f32 %v561_v25 }
 0x138   : > { %v782_v26 = vpop.eup %781 }
 0x139   : > { %565 = vst.msk [vmem:[%s141_s19] sm:$0xff] %vm564_vm0, %v782_v26 }
 0x13a PF: > { %s12_s9 = sadd.s32 1, %s789_s9  }
 0x13b   : > { %p9_p4 = scmp.ge.s32.totalorder %s12_s9, 5  }
 0x13d   :  { %11 = sbr.rel (!%p9_p4) target bundleno = 1 (0x1), region = 58 }

</bundles_post_ra>
